<compile_context>
chip_gen: v7x
topology: tpu7x:2x2x1
jax: 0.10.0
libtpu: 0.0.40
codegen_flags: <defaults>
</compile_context>

<pallas_src>
import jax
import jax.numpy as jnp
from jax.experimental import pallas as pl
from jax.experimental.pallas import tpu as pltpu


def _round_up(n: int, m: int) -> int:
    return (n + m - 1) // m * m


def _bayes_ele_mtlr_kernel(x_ref, w1_ref, w2g_ref, b2g_ref, out_ref):
    """One (sample, batch-tile) grid point of the fused forward pass.

    x_ref   : (TB, F)     bf16  input tile (shared across samples)
    w1_ref  : (1, 1, F)   f32   elementwise l1 weights for sample s
    w2g_ref : (1, F, Tp)  bf16  fused (W2 @ G) for sample s, (in, out) layout
    b2g_ref : (1, 1, Tp)  f32   fused (b2 @ G) for sample s
    out_ref : (1, TB, Tp) f32
    """
    # Elementwise Bayesian layer + ReLU (f32 on the VPU).
    x = x_ref[...].astype(jnp.float32)
    h = jnp.maximum(x * w1_ref[0], 0.0)
    # TODO(synk): training-path dropout mask not applied here.

    # Single fused matmul on the MXU: bf16 operands, f32 accumulation,
    # bias add in f32, lane-dense (Tp multiple of 128) store.
    out_ref[0] = jnp.dot(h.astype(jnp.bfloat16), w2g_ref[0],
                         preferred_element_type=jnp.float32) + b2g_ref[0]


def bayes_ele_mtlr_forward(x, l1_weight, l2_weight, l2_bias, G, *, block_b=256):
    """Fused BayesEleMtlr forward.

    x         : (B, F)      float  input features
    l1_weight : (S, F)      per-sample elementwise weights of l1
    l2_weight : (S, F, K)   per-sample l2 weights, (in, out) layout
    l2_bias   : (S, K)      per-sample l2 biases
    G         : (K, K+1)    lower-triangular ones buffer
    returns   : (S, B, K+1) float32
    """
    B, F = x.shape
    S, _, K = l2_weight.shape
    T = G.shape[1]  # K + 1

    # Lane-dense output width; zero-padding is an exact no-op for the matmul.
    Tp = _round_up(T, 128)
    TB = min(block_b, _round_up(B, 8))
    Bp = _round_up(B, TB)
    nb = Bp // TB

    # Fuse l2 and the MTLR cumulative map once, in f32 (tiny: S*F*K*T flops).
    Gf = G.astype(jnp.float32)
    w2g = jnp.einsum("sfk,kt->sft", l2_weight.astype(jnp.float32), Gf)
    b2g = jnp.einsum("sk,kt->st", l2_bias.astype(jnp.float32), Gf)

    x_p = jnp.zeros((Bp, F), jnp.bfloat16).at[:B].set(x.astype(jnp.bfloat16))
    w1_p = l1_weight.astype(jnp.float32).reshape(S, 1, F)
    w2g_p = jnp.zeros((S, F, Tp), jnp.bfloat16).at[:, :, :T].set(
        w2g.astype(jnp.bfloat16))
    b2g_p = jnp.zeros((S, 1, Tp), jnp.float32).at[:, 0, :T].set(b2g)

    flops = 2 * S * Bp * F * Tp + 2 * S * Bp * F
    bytes_accessed = (S * x_p.size * 2 + w1_p.size * 4 + w2g_p.size * 2 +
                      b2g_p.size * 4 + S * Bp * Tp * 4)

    out = pl.pallas_call(
        _bayes_ele_mtlr_kernel,
        out_shape=jax.ShapeDtypeStruct((S, Bp, Tp), jnp.float32),
        grid=(S, nb),
        in_specs=[
            pl.BlockSpec((TB, F), lambda s, i: (i, 0)),        # x tile
            pl.BlockSpec((1, 1, F), lambda s, i: (s, 0, 0)),   # l1 weight[s]
            pl.BlockSpec((1, F, Tp), lambda s, i: (s, 0, 0)),  # fused W2G[s]
            pl.BlockSpec((1, 1, Tp), lambda s, i: (s, 0, 0)),  # fused b2G[s]
        ],
        out_specs=pl.BlockSpec((1, TB, Tp), lambda s, i: (s, i, 0)),
        compiler_params=pltpu.CompilerParams(
            dimension_semantics=("parallel", "parallel")),
        cost_estimate=pl.CostEstimate(
            flops=int(flops), transcendentals=0,
            bytes_accessed=int(bytes_accessed)),
    )(x_p, w1_p, w2g_p, b2g_p)

    return out[:, :B, :T]


def init_params(key, in_features, num_time_bins):
    """num_time_bins follows the PyTorch ctor arg: l2 maps F -> num_time_bins,
    G = tril(ones(num_time_bins, num_time_bins+1))."""
    K = num_time_bins
    ks = jax.random.split(key, 3)
    u = lambda k, shape: jax.random.uniform(k, shape, jnp.float32, -0.2, 0.2)
    l1_mu = u(ks[0], (in_features,))
    l1_rho = jnp.full((in_features,), -5.0, jnp.float32)
    l2_mu = u(ks[1], (in_features, K))          # (in, out) layout
    l2_rho = jnp.full((in_features, K), -5.0, jnp.float32)
    b2_mu = u(ks[2], (K,))
    b2_rho = jnp.full((K,), -5.0, jnp.float32)
    G = jnp.tril(jnp.ones((K, K + 1), jnp.float32))
    return (l1_mu, l1_rho, l2_mu, l2_rho, b2_mu, b2_rho), G


def sample_layer_weights(params, key, n_samples, sample):
    """Reparameterized draws w = mu + softplus(rho) * eps, stacked on axis 0.
    With sample=False the means are broadcast to n_samples (module semantics)."""
    l1_mu, l1_rho, l2_mu, l2_rho, b2_mu, b2_rho = params
    if not sample:
        tile = lambda a: jnp.broadcast_to(a, (n_samples,) + a.shape)
        return tile(l1_mu), tile(l2_mu), tile(b2_mu)
    k1, k2, k3 = jax.random.split(key, 3)
    draw = lambda k, mu, rho: mu + jax.nn.softplus(rho) * jax.random.normal(
        k, (n_samples,) + mu.shape, mu.dtype)
    return draw(k1, l1_mu, l1_rho), draw(k2, l2_mu, l2_rho), draw(k3, b2_mu, b2_rho)


def _reference_forward_f32(x, l1_weight, l2_weight, l2_bias, G):
    """Pure-f32 unfused reference with the module's exact structure."""
    h = jnp.maximum(x[None] * l1_weight[:, None, :], 0.0)
    logits = jnp.einsum("sbf,sfk->sbk", h, l2_weight) + l2_bias[:, None, :]
    return jnp.einsum("sbk,kt->sbt", logits, G)


def _reference_forward_mirrored(x, l1_weight, l2_weight, l2_bias, G):
    """Reference mirroring the kernel numerics (fused W2@G, bf16 MXU operands,
    f32 accumulation and f32 elementwise math)."""
    Gf = G.astype(jnp.float32)
    w2g = jnp.einsum("sfk,kt->sft", l2_weight.astype(jnp.float32), Gf)
    b2g = jnp.einsum("sk,kt->st", l2_bias.astype(jnp.float32), Gf)
    xq = x.astype(jnp.bfloat16).astype(jnp.float32)
    h = jnp.maximum(xq[None] * l1_weight[:, None, :].astype(jnp.float32), 0.0)
    out = jnp.einsum("sbf,sft->sbt",
                     h.astype(jnp.bfloat16), w2g.astype(jnp.bfloat16),
                     preferred_element_type=jnp.float32)
    return out + b2g[:, None, :]


if __name__ == "__main__":
    key = jax.random.PRNGKey(0)
    k_p, k_x, k_s = jax.random.split(key, 3)

    IN_FEATURES = 32      # survival-data features; hidden_size == in_features
    NUM_TIME_BINS = 10    # ctor arg; model outputs NUM_TIME_BINS + 1 columns
    BATCH = 8
    N_SAMPLES = 2

    params, G = init_params(k_p, IN_FEATURES, NUM_TIME_BINS)
    x = jax.random.normal(k_x, (BATCH, IN_FEATURES), jnp.float32)

    # Bayesian sampled path (sample=True, n_samples>1) in a single pallas_call.
    w1_s, w2_s, b2_s = sample_layer_weights(params, k_s, N_SAMPLES, sample=True)

    out = bayes_ele_mtlr_forward(x, w1_s, w2_s, b2_s, G)
    out = jax.block_until_ready(out)
    assert out.shape == (N_SAMPLES, BATCH, NUM_TIME_BINS + 1)

    # Tight check vs. a reference with matching (bf16-MXU) numerics.
    ref_m = jax.block_until_ready(
        _reference_forward_mirrored(x, w1_s, w2_s, b2_s, G))
    err_m = float(jnp.max(jnp.abs(out - ref_m)))
    assert err_m < 1e-3, f"mirrored-numerics max abs error {err_m}"

    # Loose semantic check vs. the pure-f32 module forward.
    ref_f = jax.block_until_ready(
        _reference_forward_f32(x, w1_s, w2_s, b2_s, G))
    err_f = float(jnp.max(jnp.abs(out - ref_f)))
    assert err_f < 5e-2, f"f32-reference max abs error {err_f}"

    print("KERNEL_OK")
</pallas_src>

<mosaic_0001>
module attributes {stable_mosaic.version = 11 : i64} {
  func.func @_bayes_ele_mtlr_kernel(%arg0: i32, %arg1: i32, %arg2: memref<8x32xbf16, #tpu.memory_space<vmem>>, %arg3: memref<1x1x32xf32, #tpu.memory_space<vmem>>, %arg4: memref<1x32x128xbf16, #tpu.memory_space<vmem>>, %arg5: memref<1x1x128xf32, #tpu.memory_space<vmem>>, %arg6: memref<1x8x128xf32, #tpu.memory_space<vmem>>) attributes {dimension_semantics = [#tpu.dimension_semantics<parallel>, #tpu.dimension_semantics<parallel>], iteration_bounds = array<i64: 2, 1>, scalar_prefetch = 0 : i64, scratch_operands = 0 : i64, tpu.core_type = #tpu.core_type<tc>, window_params = [{transform_indices = @transform_0, window_bounds = array<i64: 8, 32>}, {transform_indices = @transform_1, window_bounds = array<i64: 1, 1, 32>}, {transform_indices = @transform_2, window_bounds = array<i64: 1, 32, 128>}, {transform_indices = @transform_3, window_bounds = array<i64: 1, 1, 128>}, {transform_indices = @transform_4, window_bounds = array<i64: 1, 8, 128>}]} {
    %c0 = arith.constant 0 : index
    %c0_0 = arith.constant 0 : index
    %0 = vector.load %arg2[%c0, %c0_0] : memref<8x32xbf16, #tpu.memory_space<vmem>>, vector<8x32xbf16>
    %1 = arith.extf %0 : vector<8x32xbf16> to vector<8x32xf32>
    %c0_1 = arith.constant 0 : index
    %c0_2 = arith.constant 0 : index
    %c0_3 = arith.constant 0 : index
    %2 = vector.load %arg3[%c0_1, %c0_2, %c0_3] : memref<1x1x32xf32, #tpu.memory_space<vmem>>, vector<1x1x32xf32>
    %3 = vector.shape_cast %2 : vector<1x1x32xf32> to vector<1x32xf32>
    %4 = vector.broadcast %3 : vector<1x32xf32> to vector<8x32xf32>
    %5 = arith.mulf %1, %4 : vector<8x32xf32>
    %cst = arith.constant 0.000000e+00 : f32
    %6 = vector.broadcast %cst : f32 to vector<8x32xf32>
    %7 = arith.maximumf %5, %6 : vector<8x32xf32>
    %8 = arith.truncf %7 : vector<8x32xf32> to vector<8x32xbf16>
    %c0_4 = arith.constant 0 : index
    %c0_5 = arith.constant 0 : index
    %c0_6 = arith.constant 0 : index
    %9 = vector.load %arg4[%c0_4, %c0_5, %c0_6] : memref<1x32x128xbf16, #tpu.memory_space<vmem>>, vector<1x32x128xbf16>
    %10 = vector.shape_cast %9 : vector<1x32x128xbf16> to vector<32x128xbf16>
    %cst_7 = arith.constant dense<0.000000e+00> : vector<8x128xf32>
    %11 = tpu.matmul %8, %10, %cst_7 {dimension_numbers = #tpu.dot_dimension_numbers<[1], [0], [0], [1], [0, 0, 1, 1], [], []>} : vector<8x32xbf16>, vector<32x128xbf16>, vector<8x128xf32> -> vector<8x128xf32>
    %c0_8 = arith.constant 0 : index
    %c0_9 = arith.constant 0 : index
    %c0_10 = arith.constant 0 : index
    %12 = vector.load %arg5[%c0_8, %c0_9, %c0_10] : memref<1x1x128xf32, #tpu.memory_space<vmem>>, vector<1x1x128xf32>
    %13 = vector.shape_cast %12 : vector<1x1x128xf32> to vector<1x128xf32>
    %14 = vector.broadcast %13 : vector<1x128xf32> to vector<8x128xf32>
    %15 = arith.addf %11, %14 : vector<8x128xf32>
    %c0_11 = arith.constant 0 : index
    %c0_12 = arith.constant 0 : index
    %c0_13 = arith.constant 0 : index
    %16 = vector.load %arg6[%c0_11, %c0_12, %c0_13] : memref<1x8x128xf32, #tpu.memory_space<vmem>>, vector<1x8x128xf32>
    %17 = vector.shape_cast %16 : vector<1x8x128xf32> to vector<8x128xf32>
    %18 = vector.shape_cast %15 : vector<8x128xf32> to vector<1x8x128xf32>
    tpu.vector_store %arg6[%c0_11, %c0_12, %c0_13], %18 {strides = array<i32>} : memref<1x8x128xf32, #tpu.memory_space<vmem>>, vector<1x8x128xf32>,
    return
  }
  func.func @transform_0(%arg0: i32, %arg1: i32) -> (i32, i32) {
    %c0_i32 = arith.constant 0 : i32
    %c0_i32_0 = arith.constant 0 : i32
    return %arg1, %c0_i32 : i32, i32
  }
  func.func @transform_1(%arg0: i32, %arg1: i32) -> (i32, i32, i32) {
    %c0_i32 = arith.constant 0 : i32
    %c0_i32_0 = arith.constant 0 : i32
    %c0_i32_1 = arith.constant 0 : i32
    return %arg0, %c0_i32, %c0_i32_0 : i32, i32, i32
  }
  func.func @transform_2(%arg0: i32, %arg1: i32) -> (i32, i32, i32) {
    %c0_i32 = arith.constant 0 : i32
    %c0_i32_0 = arith.constant 0 : i32
    %c0_i32_1 = arith.constant 0 : i32
    return %arg0, %c0_i32, %c0_i32_0 : i32, i32, i32
  }
  func.func @transform_3(%arg0: i32, %arg1: i32) -> (i32, i32, i32) {
    %c0_i32 = arith.constant 0 : i32
    %c0_i32_0 = arith.constant 0 : i32
    %c0_i32_1 = arith.constant 0 : i32
    return %arg0, %c0_i32, %c0_i32_0 : i32, i32, i32
  }
  func.func @transform_4(%arg0: i32, %arg1: i32) -> (i32, i32, i32) {
    %c0_i32 = arith.constant 0 : i32
    %c0_i32_0 = arith.constant 0 : i32
    return %arg0, %arg1, %c0_i32 : i32, i32, i32
  }
}

</mosaic_0001>

<bundles_post_ra>
// kernel: tpu_custom_call.1
= control target key start
LH: loop header
LB: loop body
LE: loop exit
PB: predicated region body
PF: predicated region fallthrough
CT: control target
= control target key end

     0   :  { %9 = vsyncpa [#allocation3], 0  ;;  %s1003_s0 = inlined_call_operand.hbm [shape: bf16[8,32], index: 0, kind: input, shape index: {}]   ;;  %s1004_s1 = inlined_call_operand.vmem [shape: f32[2,1,32], index: 1, kind: input, shape index: {}]   ;;  %s1005_s2 = inlined_call_operand.hbm [shape: bf16[2,32,128], index: 2, kind: input, shape index: {}]   ;;  %s1006_s3 = inlined_call_operand.vmem [shape: f32[2,1,128], index: 3, kind: input, shape index: {}]   ;;  %s1007_s4 = inlined_call_operand.hbm [shape: f32[2,8,128], index: 4, kind: output, shape index: {}]  }
   0x1   :  { %10 = vsyncpa [#allocation6], 0 }
   0x2   :  { %12 = vsyncpa [#allocation6 + $0x1], 0 }
   0x3   :  { %13 = vsyncpa [#allocation4], 0 }
   0x4   :  { %15 = vsyncpa [#allocation4 + $0x1], 0  ;;  %s775_s15 = smov 0   ;;  %s777_s16 = smov 0  }
   0x5   :  { %s779_s17 = smov 0   ;;  %s781_s18 = smov 0  }
   0x6   :  { %s783_s19 = smov 0   ;;  %s785_s20 = smov 0  }
   0x7 LB: > { %s485_s21 = sadd.s32 4294967295, %s741_s20   ;;  %s486_s22 = sadd.s32 4294967294, %s741_s20   ;;  %s741_s20 = sphi %s785_s20, %s21_s20   ;;  %s737_s19 = sphi %s783_s19, %s1035_s19   ;;  %s733_s18 = sphi %s781_s18, %s1034_s18   ;;  %s729_s17 = sphi %s779_s17, %s1033_s17   ;;  %s725_s16 = sphi %s777_s16, %s1032_s16   ;;  %s721_s15 = sphi %s775_s15, %s1031_s15  }
   0x8   : > { %s92_s23 = sadd.s32 1, %s729_s17  ;;  %p99_p0 = scmp.ne.s32.totalorder %s729_s17, %s725_s16 }
   0x9   : > { %p100_p1 = scmp.eq.s32.totalorder %s741_s20, 0  ;;  %p105_p2 = scmp.ne.s32.totalorder %s725_s16, %s721_s15 }
   0xa   : > { %p813_p3 = scmp.eq.s32.totalorder %s485_s21, 0  ;;  %p157_p4 = scmp.eq.s32.totalorder %s485_s21, 1 }
   0xb   : > { %p817_p5 = por %p100_p1, %p99_p0  ;;  %p163_p6 = scmp.eq.s32.totalorder %s486_s22, 1 }
   0xc   : > { %s1014_s24 = scalar_select %p813_p3, 1, 0 }
   0xd   : > { %p823_p7 = por %p813_p3, %p105_p2  ;;  %p827_p8 = por %p157_p4, %p99_p0 }
   0xe   : > { %p831_p9 = por %p163_p6, %p105_p2  ;;  %p487_p10 = scmp.ge.s32.totalorder %s741_s20, 1 }
   0xf   : > { %s1016_s26 = scalar_select %p823_p7, 1, 0 }
  0x10   : > { %s1017_s27 = scalar_select %p827_p8, 1, 0 }
  0x11   : > { %s1018_s28 = scalar_select %p831_p9, 1, 0 }
  0x12   : > { %p170_p11 = scmp.lt.s32.totalorder %s741_s20, 3  ;;  %s743_s30 = smov [#allocation2]  }
  0x13   : > { %s185_s5 = sshll.u32 %s743_s30, 4  ;;  %p539_p1 = scmp.lt.s32.totalorder %s741_s20, 2  ;;  %s186_s5 = int_to_ptr.vmem [resolvable:$true] %s185_s5 }
  0x14   : > { %p838_p13 = pnand %p487_p10, %p170_p11  ;;  %s33_s8 = sadd.s32 1, %s737_s19 }
  0x15   : > { %p847_p4 = pnand %p539_p1, %p817_p5  ;;  %p858_p6 = scmp.ge.s32.totalorder %s33_s8, 2 }
  0x16   : > { %s1019_s29 = scalar_select %p838_p13, 1, 0 }
  0x17   : > { %p526_p0 = pneg %p838_p13  ;;  %s202_s10 = sand.u32 1, %s729_s17  }
  0x18   : > { %s1020_s6 = scalar_select %p847_p4, 1, 0 }
  0x19   : > { %p853_p2 = pnand %p526_p0, %p813_p3  ;;  %s597_s13 = scalar_lea.hbm %s1003_s0, 64 }
  0x1a   : > { %s1022_s9 = scalar_select %p858_p6, 1, 0 }
  0x1b   : > { %p598_p5 = scmp.ne.s32.totalorder %s1003_s0, %s597_s13  ;;  %p599_p10 = pneg %p853_p2 }
  0x1c   : > { %p604_p0 = scmp.lt.u32.totalorder %s597_s13, %s1003_s0 }
  0x1d   : > { %p600_p11 = pnand %p599_p10, %p598_p5 }
  0x1f   : > { %p601_p1 = pneg %p600_p11 }
  0x21   : > { %p606_p12 = pnand %p604_p0, %p601_p1 }
  0x23   : > { %609 = shalt.err (!%p606_p12)
}
  0x24   : > { %s610_s30 = scalar_lea.vmem %s186_s5, 64  ;;  %p618_p3 = scmp.lt.s32.totalorder %s186_s5, %s186_s5 }
  0x25   : > { %p611_p9 = scmp.ne.s32.totalorder %s186_s5, %s610_s30  ;;  %p619_p13 = scmp.lt.s32.totalorder %s610_s30, %s610_s30 }
  0x27   : > { %p613_p8 = pnand %p611_p9, %p599_p10  ;;  %p620_p4 = por %p619_p13, %p618_p3 }
  0x29   : > { %p614_p7 = pneg %p613_p8 }
  0x2b   : > { %p621_p6 = pnand %p620_p4, %p614_p7 }
  0x2d   : > { %624 = shalt.err (!%p621_p6)
}
  0x2e   : > { %529 = dma.hbm_to_vmem [thread:$0]  (!%p853_p2), %s1003_s0, 64, %s186_s5, [#allocation3]  }
  0x2f   : > { %p1023_p9 = scmp.ne.s32.totalorder %s1022_s9, 0  ;;  %s490_s13 = sshll.u32 %s202_s10, 4 }
  0x30   : > { %s506_s21 = sshll.u32 %s737_s19, 8  ;;  %s206_s30 = scalar_lea.vmem [#allocation5], %s490_s13 }
  0x31   : > { %s1037_s8 = smov (%p1023_p9, %s33_s8), 0  ;;  %s889_s25 = scalar_lea.hbm %s1005_s2, %s506_s21 }
  0x32   : > { %s89_s14 = ssub.s32 %s737_s19, %s1037_s8  ;;  %s213_s11 = sshll.u32 %s206_s30, 4  ;;  %s896_s11 = int_to_ptr.vmem [resolvable:$true] %s213_s11 }
  0x33   : > { %p90_p3 = scmp.eq.s32.totalorder %s89_s14, 0  ;;  %s898_s9 = scalar_lea.sflag [#allocation6], %s202_s10 }
  0x34   : > { %s625_s12 = scalar_lea.hbm %s889_s25, 256  ;;  %p1024_p8 = scmp.ne.s32.totalorder %s1020_s6, 0 }
  0x35   : > { %s894_s5 = scalar_select %p90_p3, %s729_s17, %s92_s23  }
  0x36   : > { %p626_p7 = scmp.ne.s32.totalorder %s889_s25, %s625_s12  ;;  %p627_p12 = pneg %p1024_p8 }
  0x37   : > { %s630_s13 = scalar_lea.hbm %s1005_s2, 512  ;;  %p631_p2 = scmp.lt.u32.totalorder %s889_s25, %s1005_s2 }
  0x38   : > { %p628_p13 = pnand %p627_p12, %p626_p7  ;;  %p632_p6 = scmp.lt.u32.totalorder %s630_s13, %s625_s12 }
  0x39   : > { %p634_p10 = scmp.lt.u32.totalorder %s625_s12, %s889_s25 }
  0x3a   : > { %p629_p4 = pneg %p628_p13  ;;  %p633_p5 = por %p632_p6, %p631_p2 }
  0x3c   : > { %p635_p11 = por %p634_p10, %p633_p5 }
  0x3e   : > { %p636_p1 = pnand %p635_p11, %p629_p4 }
  0x40   : > { %639 = shalt.err (!%p636_p1)
}
  0x41   : > { %s640_s23 = scalar_lea.vmem %s896_s11, 256  ;;  %s744_s10 = smov [#allocation5]  }
  0x42   : > { %p641_p0 = scmp.ne.s32.totalorder %s896_s11, %s640_s23  ;;  %s645_s30 = sshll.u32 %s744_s10, 4  ;;  %s646_s30 = int_to_ptr.vmem [resolvable:$false] %s645_s30 }
  0x43   : > { %s647_s14 = scalar_lea.vmem %s646_s30, 512  ;;  %p648_p7 = scmp.lt.s32.totalorder %s896_s11, %s646_s30 }
  0x44   : > { %p643_p9 = pnand %p641_p0, %p627_p12  ;;  %p649_p13 = scmp.lt.s32.totalorder %s647_s14, %s640_s23 }
  0x46   : > { %p644_p3 = pneg %p643_p9  ;;  %p650_p2 = por %p649_p13, %p648_p7 }
  0x48   : > { %p651_p6 = pnand %p650_p2, %p644_p3 }
  0x4a   : > { %654 = shalt.err (!%p651_p6)
}
  0x4b   : > { %s745_s12 = smov 64   ;;  %s746_s21 = smov 4  }
  0x4c   : > { %533 = dma.hbm_to_vmem [thread:$0]  (!%p1024_p8), %s889_s25, 256, %s896_s11, %s898_s9, %s745_s12, %s745_s12, %s746_s21  }
  0x4d   : > { %p1025_p12 = scmp.ne.s32.totalorder %s1019_s29, 0 }
  0x4e   : > { %p1026_p4 = scmp.ne.s32.totalorder (!%p1025_p12), %s1014_s24, 0 }
  0x4f   : > { %231 = sbr.rel (%p1025_p12) target bundleno = 331 (0x14b), region = 36 }
  0x56   : > { %708 = dma.done.wait (%p1026_p4), [#allocation3], 64  }
  0x57   : > { %710 = vsyncadd (%p1026_p4), [#allocation3], 4294967232  ;;  %s933_s13 = sand.u32 1, %s725_s16   ;;  %p1027_p5 = scmp.ne.s32.totalorder %s1016_s26, 0 }
  0x58   : > { %s495_s7 = sshll.u32 %s933_s13, 4  ;;  %s238_s22 = scalar_lea.sflag [#allocation6], %s933_s13 }
  0x59   : > { %s241_s23 = scalar_lea.vmem [#allocation5], %s495_s7 }
  0x5a   : > { %712 = dma.done.wait (%p1027_p5), %s238_s22, 256  }
  0x5b   : > { %714 = vsyncadd (%p1027_p5), %s238_s22, 4294967040  ;;  %p272_p8 = scmp.lt.s32.totalorder %s733_s18, 1  ;;  %v747_v0 = vmov 0.0   ;;  %vm748_vm0 = vmmov 0   ;;  %v595_v1 = vld [vmem:[%s241_s23] sm:$0xff]   ;;  %v596_v2 = vld [vmem:[%s241_s23 + $0x8] sm:$0xff]  }
  0x5c   : > { %510 = vmatprep.subr.bf16.mxu0 %v747_v0  ;;  %514 = vmatprep.mubr.msk.bf16.mxu0 %vm748_vm0, %v747_v0  ;;  %v279_v3 = vld [vmem:[#allocation2] sm:$0xf]  ;;  %vm314_vm1 = vcmask 261120   ;;  %s496_s26 = sshll.u32 %s933_s13, 3  ;;  %s503_s30 = sshll.u32 %s733_s18, 7 }
  0x5d   : > { %s273_s24 = scalar_select %p272_p8, %s733_s18, 1  ;;  %511 = vmatpush3.bf16.msra.mxu0 %v595_v1  ;;  %v280_v5 = vunpack.c.l.bf16 %v279_v3 }
  0x5e   : > { %512 = vmatprep.subr.bf16.mxu0 %v747_v0  ;;  %s271_s14 = scalar_lea.vmem [#allocation7], %s496_s26  ;;  %s954_s22 = scalar_lea.hbm %s1007_s4, %s503_s30 }
  0x5f   : > { %s274_s25 = scalar_lea.vmem %s1004_s1, %s273_s24  ;;  %s277_s10 = scalar_lea.vmem %s1006_s3, %s273_s24 }
  0x60   : > { %v497_v4 = vld [vmem:[%s274_s25] ss:$0 sm:$0xff]  ;;  %s374_s12 = sshll.u32 %s271_s14, 4  ;;  %s360_s23 = scalar_lea.sflag [#allocation4], %s933_s13  ;;  %s956_s12 = int_to_ptr.vmem [resolvable:$true] %s374_s12 }
  0x61   : > { %v288_v6 = vmul.f32 %v497_v4, %v280_v5  ;;  %513 = vmatpush3.bf16.msra.mxu0 %v596_v2  ;;  %v498_v9 = vld [vmem:[%s277_s10] ss:$0 sm:$0xff]  ;;  %s655_s18 = scalar_lea.vmem %s956_s12, 128  ;;  %p1028_p11 = scmp.ne.s32.totalorder %s1017_s27, 0 }
  0x62   : > { %p656_p10 = scmp.ne.s32.totalorder %s956_s12, %s655_s18  ;;  %s749_s24 = smov [#allocation7]  }
  0x63   : > { %v289_v7 = vmax.f32 %v288_v6, 0.0  ;;  %s659_s29 = sshll.u32 %s749_s24, 4  ;;  %s660_s29 = int_to_ptr.vmem [resolvable:$false] %s659_s29 }
  0x64   : > { %p657_p1 = pnand %p656_p10, %p1028_p11  ;;  %s661_s6 = scalar_lea.vmem %s660_s29, 256 }
  0x65   : > { %v290_v8 = vpack.c.bf16 %v289_v7, %v289_v7  ;;  %p662_p9 = scmp.lt.s32.totalorder %s956_s12, %s660_s29  ;;  %p663_p3 = scmp.lt.s32.totalorder %s661_s6, %s655_s18 }
  0x66   : > { %p658_p0 = pneg %p657_p1 }
  0x67   : > { %515 = vmatmul.mubr.msk.bf16.vlgmr.msra.gmra.mrb[0].mxu0 %vm314_vm1, %v290_v8  ;;  %p664_p7 = por %p663_p3, %p662_p9 }
  0x69   : > { %p665_p13 = pnand %p664_p7, %p658_p0 }
 0x13a   : > { %v352_v10 = vpop.f32.mrb[0].mxu0 }
 0x13b   : > { %v353_v11 = vadd.f32 %v498_v9, %v352_v10  ;;  %v516_v12 = vpop.f32.mrb[1].mxu0 }
 0x13c   : > { %v355_v13 = vpop.f32.mrb[2].mxu0 }
 0x13d   : > { %358 = vst [vmem:[%s271_s14] sm:$0xff] %v353_v11  ;;  %v517_v14 = vpop.f32.mrb[3].mxu0 }
 0x13e   : > { %668 = shalt.err (!%p665_p13)
}
 0x13f   : > { %s669_s13 = scalar_lea.hbm %s954_s22, 128  ;;  %s673_s11 = scalar_lea.hbm %s1007_s4, 256 }
 0x140   : > { %p670_p2 = scmp.ne.s32.totalorder %s954_s22, %s669_s13  ;;  %p674_p4 = scmp.lt.u32.totalorder %s954_s22, %s1007_s4 }
 0x141   : > { %p675_p5 = scmp.lt.u32.totalorder %s673_s11, %s669_s13  ;;  %p677_p10 = scmp.lt.u32.totalorder %s669_s13, %s954_s22 }
 0x142   : > { %p671_p6 = pnand %p670_p2, %p1028_p11 }
 0x143   : > { %p676_p8 = por %p675_p5, %p674_p4 }
 0x144   : > { %p672_p12 = pneg %p671_p6 }
 0x145   : > { %p678_p1 = por %p677_p10, %p676_p8 }
 0x147   : > { %p679_p0 = pnand %p678_p1, %p672_p12 }
 0x149   : > { %682 = shalt.err (!%p679_p0)
}
 0x14a   : > { %524 = dma.vmem_to_hbm [thread:$0]  (%p1028_p11), %s956_s12, 128, %s954_s22, %s360_s23  }
 0x14b PF: > { %s386_s30 = sand.u32 1, %s721_s15   ;;  %p1029_p9 = scmp.ne.s32.totalorder %s1018_s28, 0 }
 0x14c   : > { %p1030_p3 = scmp.ge.s32.totalorder %s741_s20, 2  ;;  %s387_s14 = scalar_lea.sflag [#allocation4], %s386_s30 }
 0x14e   : > { %p535_p7 = pnand %p1030_p3, %p1029_p9 }
 0x150   : > { %716 = dma.done.wait (!%p535_p7), %s387_s14, 128  }
 0x151   : > { %718 = vsyncadd (!%p535_p7), %s387_s14, 4294967168  ;;  %s21_s20 = sadd.s32 1, %s741_s20   ;;  %s1031_s15 = smov %s725_s16 }
 0x152   : > { %p18_p13 = scmp.ge.s32.totalorder %s21_s20, 4   ;;  %s1032_s16 = smov %s729_s17 }
 0x153   : > { %s1033_s17 = smov %s894_s5  ;;  %s1034_s18 = smov %s737_s19 }
 0x154   : > { %s1035_s19 = smov %s1037_s8  ;;  %20 = sbr.rel (!%p18_p13) target bundleno = 7 (0x7), region = 93 }
 0x15b   :  { %392 = vsyncpa [#allocation3], 1 }
 0x15c   :  { %394 = vsyncpa [#allocation3 + $0x1], 1 }
 0x15d   :  { %395 = vsyncpa [#allocation6], 1 }
 0x15e   :  { %397 = vsyncpa [#allocation6 + $0x1], 1 }
 0x15f   :  { %398 = vsyncpa [#allocation4], 1 }
 0x160   :  { %400 = vsyncpa [#allocation4 + $0x1], 1 }

</bundles_post_ra>
